<compile_context>
chip_gen: v7x
topology: tpu7x:2x2x1
jax: 0.10.0
libtpu: 0.0.40
codegen_flags: <defaults>
</compile_context>

<pallas_src>
import numpy as np
import jax
import jax.numpy as jnp
from jax.experimental import pallas as pl
from jax.experimental.pallas import tpu as pltpu

LEAKY_SLOPE = 0.2
FLRELU_SCALE = float(np.sqrt(2.0))  # FusedLeakyReLU scale (folded into w2 in the kernel path)


def make_kernel_np(k):
    k = np.asarray(k, dtype=np.float32)
    k = np.outer(k, k)
    return k / k.sum()


K_BASE = make_kernel_np([1, 3, 3, 1])   # registered buffer `kernel` (unused in forward)
K_UP = K_BASE * 4.0                     # Upsample kernel = make_kernel * factor**2


# ---------------------------------------------------------------------------
# Chip-aware VMEM budgeting (explicit limits instead of the scoped default).
# ---------------------------------------------------------------------------
def _vmem_capacity_bytes():
    try:
        info = pltpu.get_tpu_info()
        cap = int(getattr(info, "vmem_capacity_bytes", 0))
        if cap > 0:
            return cap
    except Exception:
        pass
    return 64 << 20  # conservative fallback: v7x per-TensorCore VMEM


_VMEM_CAP = _vmem_capacity_bytes()
_VMEM_LIMIT = min(_VMEM_CAP * 3 // 4, 100 << 20)   # explicit scoped limit we request
_TILE_BUDGET = _VMEM_LIMIT * 2 // 3                # per-grid-step footprint budget (headroom)


# ---------------------------------------------------------------------------
# 1-D up-2 FIR as a (L, 2L) matrix: (x @ A) == upfirdn1d(x, [1,3,3,1]/4, up=2, pad=(2,1)).
# K_UP == outer([1,3,3,1]/4, [1,3,3,1]/4) so the 2-D upsample separates into
# out = A_H^T @ X @ A_W per channel.  Entries are 0.25/0.75 -> exact in bf16.
# ---------------------------------------------------------------------------
def _up2_fir_matrix(L):
    k1 = np.array([1.0, 3.0, 3.0, 1.0], np.float32) / 4.0
    kf = k1[::-1]          # kernel flip (symmetric -> no-op, kept for clarity)
    p0 = 2                 # pad = (2, 1), out length = 2L
    A = np.zeros((L, 2 * L), np.float32)
    for j in range(L):
        for t in range(4):
            v = p0 + 2 * j - t
            if 0 <= v < 2 * L:
                A[j, v] += kf[t]
    return A


# ---------------------------------------------------------------------------
# Kernel 1: fused  y = (sqrt2*W2) @ leaky_relu(W1 @ x + b1) + b2
# Lane-dense layout: x block is (cin, tm) with tm (multiple of 128 / full H*W) on lanes.
# ---------------------------------------------------------------------------
def _pointwise_kernel(x_ref, w1_ref, b1_ref, w2_ref, b2_ref, o_ref):
    x = x_ref[0]                                                       # (cin, tm)
    h = jnp.dot(w1_ref[...], x, preferred_element_type=jnp.float32) + b1_ref[...]
    h = h * jnp.where(h >= 0, 1.0, LEAKY_SLOPE)        # 1 select + 1 mul (sqrt2 folded in w2)
    y = jnp.dot(w2_ref[...], h, preferred_element_type=jnp.float32) + b2_ref[...]
    o_ref[0] = y.astype(o_ref.dtype)


def _pick_m_tile(M, cin, hid, cout, n_batch, budget):
    """VMEM-aware M-tile: footprint ~ (2*cin + 2*cout + hid)*tm*4 bytes
    (double-buffered in/out blocks + the (hid,tm) hidden intermediate);
    also guarantee >=2 (ideally >=8) grid steps for v7x megacore / pipelining."""
    bytes_per_col = (2 * cin + 2 * cout + hid) * 4
    cands = [t for t in (8192, 4096, 2048, 1024, 512, 256, 128) if M % t == 0]
    if not cands:
        # TODO(synk): ragged M (H*W not a multiple of 128) falls back to one full-width
        # lane-dense block; a masked tail tile would bound VMEM for huge ragged maps.
        return M
    fitting = [t for t in cands if t * bytes_per_col <= budget] or [cands[-1]]
    for min_steps, min_tile in ((8, 512), (2, 128), (1, 0)):
        for t in fitting:                               # descending
            if t >= min_tile and n_batch * (M // t) >= min_steps:
                return t
    return fitting[-1]


def pointwise_convs(x_ncm, w1_mat, b1, w2_mat, b2):
    """x_ncm: (N, cin, M) f32 -> (N, cout, M) f32.  Bandwidth-bound: lane-dense I/O,
    large-but-budgeted M tile, explicit vmem limit."""
    N, cin, M = x_ncm.shape
    hid = w1_mat.shape[0]
    cout = w2_mat.shape[0]
    tm = _pick_m_tile(M, cin, hid, cout, N, _TILE_BUDGET)
    return pl.pallas_call(
        _pointwise_kernel,
        out_shape=jax.ShapeDtypeStruct((N, cout, M), jnp.float32),
        grid=(N, M // tm),
        in_specs=[
            pl.BlockSpec((1, cin, tm), lambda n, i: (n, 0, i)),
            pl.BlockSpec((hid, cin), lambda n, i: (0, 0)),
            pl.BlockSpec((hid, 1), lambda n, i: (0, 0)),
            pl.BlockSpec((cout, hid), lambda n, i: (0, 0)),
            pl.BlockSpec((cout, 1), lambda n, i: (0, 0)),
        ],
        out_specs=pl.BlockSpec((1, cout, tm), lambda n, i: (n, 0, i)),
        compiler_params=pltpu.CompilerParams(
            dimension_semantics=("parallel", "parallel"),
            vmem_limit_bytes=int(_VMEM_LIMIT)),
    )(x_ncm, w1_mat, b1.reshape(hid, 1), w2_mat, b2.reshape(cout, 1))


# ---------------------------------------------------------------------------
# Kernel 2: 2x upsample, C_blk channels per grid step.
#   out_c = A_H^T @ x_c @ A_W  — pad + FIR + phase-interleave fused; bf16 operands,
#   f32 accumulation; output written directly in final (2H, 2W) lane-dense layout.
# ---------------------------------------------------------------------------
def _upsample_kernel(x_ref, aht_ref, aw_ref, o_ref):
    c_blk, h, w = x_ref.shape
    aw = aw_ref[...]                                                  # (w, 2w)   bf16
    aht = aht_ref[...]                                                # (2h, h)   bf16
    # FIR along W for all channels in one MXU pass: (c*h, w) @ (w, 2w).
    x2 = x_ref[...].reshape(c_blk * h, w).astype(jnp.bfloat16)
    t = jnp.dot(x2, aw, preferred_element_type=jnp.float32)           # (c*h, 2w) f32
    t = t.astype(jnp.bfloat16).reshape(c_blk, h, 2 * w)
    # FIR along H per channel (static unroll) — avoids in-register transposes.
    for c in range(c_blk):
        o_ref[c] = jnp.dot(aht, t[c],
                           preferred_element_type=jnp.float32).astype(o_ref.dtype)


def _pick_c_block(NC, H, W, budget):
    """Largest divisor of NC (<=8) whose per-step footprint fits the VMEM budget,
    while keeping >=2 grid steps for megacore sharding / pipelining."""
    per_ch = (H * W * 4) * 2          # x block, double-buffered f32
    per_ch += (4 * H * W * 4) * 2     # out block, double-buffered f32
    per_ch += H * W * 2               # bf16 copy of x
    per_ch += H * (2 * W) * (4 + 2)   # t in f32 + bf16
    per_ch += 4 * H * W * 4           # f32 result before store cast
    a_bytes = ((2 * H) * H + W * (2 * W)) * 2 * 2   # bf16 A's (budgeted as double-buffered)
    best = 1
    for c in range(1, min(NC, 8) + 1):
        if NC % c:
            continue
        if c * per_ch + a_bytes > budget:
            break
        if NC // c >= 2 or NC == 1:
            best = c
    return best


def upsample2x(x_chw, aht, aw):
    """x_chw: (NC, H, W) f32 -> (NC, 2H, 2W) f32."""
    NC, H, W = x_chw.shape
    c_blk = _pick_c_block(NC, H, W, _TILE_BUDGET)
    return pl.pallas_call(
        _upsample_kernel,
        out_shape=jax.ShapeDtypeStruct((NC, 2 * H, 2 * W), jnp.float32),
        grid=(NC // c_blk,),
        in_specs=[
            pl.BlockSpec((c_blk, H, W), lambda c: (c, 0, 0)),
            pl.BlockSpec((2 * H, H), lambda c: (0, 0)),   # constant: fetched once
            pl.BlockSpec((W, 2 * W), lambda c: (0, 0)),   # constant: fetched once
        ],
        out_specs=pl.BlockSpec((c_blk, 2 * H, 2 * W), lambda c: (c, 0, 0)),
        compiler_params=pltpu.CompilerParams(
            dimension_semantics=("parallel",),
            vmem_limit_bytes=int(_VMEM_LIMIT)),
    )(x_chw, aht, aw)


# ---------------------------------------------------------------------------
# ToSpatialCode.forward
# ---------------------------------------------------------------------------
def to_spatial_code_forward(x_nchw, params, scale):
    w1, b1, w2, b2 = params
    N, cin, H, W = x_nchw.shape
    hid = w1.shape[0]
    cout = w2.shape[0]
    s1 = 1.0 / np.sqrt(cin * 1 * 1)     # EqualConv2d scale, kernel_size=1
    s2 = 1.0 / np.sqrt(hid * 1 * 1)
    w1_mat = w1[:, :, 0, 0] * s1                        # (hid, cin)
    w2_mat = w2[:, :, 0, 0] * (s2 * FLRELU_SCALE)       # (cout, hid), sqrt(2) folded in

    # 1x1 conv chain on a free (N, cin, H*W) view of NCHW (no XLA transpose).
    y = pointwise_convs(x_nchw.reshape(N, cin, H * W), w1_mat, b1, w2_mat, b2)

    # (N, cout, H*W) -> (N*cout, H, W) is a free contiguous view; W stays on lanes.
    y = y.reshape(N * cout, H, W)
    h, w = H, W
    for _ in range(int(np.log2(scale))):   # mirrors the PyTorch loop exactly
        aht = jnp.asarray(_up2_fir_matrix(h).T, dtype=jnp.bfloat16)   # (2h, h)
        aw = jnp.asarray(_up2_fir_matrix(w), dtype=jnp.bfloat16)      # (w, 2w)
        y = upsample2x(y, aht, aw)
        h, w = 2 * h, 2 * w
    return y.reshape(N, cout, h, w)            # free view back to NCHW


# ---------------------------------------------------------------------------
# Pure-JAX f32 reference (mirrors the PyTorch ops) for verification
# ---------------------------------------------------------------------------
def upfirdn2d_ref(x, k, up=2, pad=(2, 1)):
    N, C, H, W = x.shape
    z = jnp.zeros((N, C, H * up, W * up), x.dtype).at[:, :, ::up, ::up].set(x)
    z = jnp.pad(z, ((0, 0), (0, 0), (pad[0], pad[1]), (pad[0], pad[1])))
    kf = np.asarray(k)[::-1, ::-1]
    out_h, out_w = H * up + pad[0] + pad[1] - 3, W * up + pad[0] + pad[1] - 3
    out = jnp.zeros((N, C, out_h, out_w), jnp.float32)
    for a in range(4):
        for b in range(4):
            out = out + kf[a, b] * z[:, :, a:a + out_h, b:b + out_w]
    return out


def reference_forward(x, params, scale):
    w1, b1, w2, b2 = params
    cin = x.shape[1]
    hid = w1.shape[0]
    s1 = 1.0 / np.sqrt(cin)
    s2 = 1.0 / np.sqrt(hid)
    h = jnp.einsum('nchw,kc->nkhw', x, w1[:, :, 0, 0] * s1) + b1[None, :, None, None]
    h = jnp.where(h >= 0, h, LEAKY_SLOPE * h) * FLRELU_SCALE
    y = jnp.einsum('nkhw,ok->nohw', h, w2[:, :, 0, 0] * s2) + b2[None, :, None, None]
    for _ in range(int(np.log2(scale))):
        y = upfirdn2d_ref(y, K_UP, up=2, pad=(2, 1))
    return y


if __name__ == "__main__":
    N, cin, H, W = 2, 8, 16, 16
    cout, scale = 4, 4
    hid = cin // 2

    key = jax.random.PRNGKey(0)
    k0, k1, k2, k3, k4 = jax.random.split(key, 5)
    x = jax.random.normal(k0, (N, cin, H, W), jnp.float32)
    w1 = jax.random.normal(k1, (hid, cin, 1, 1), jnp.float32)    # EqualConv2d weight
    b1 = 0.1 * jax.random.normal(k2, (hid,), jnp.float32)        # FusedLeakyReLU bias
    w2 = jax.random.normal(k3, (cout, hid, 1, 1), jnp.float32)   # EqualConv2d weight
    b2 = 0.1 * jax.random.normal(k4, (cout,), jnp.float32)       # EqualConv2d bias
    params = (w1, b1, w2, b2)

    out = jax.block_until_ready(to_spatial_code_forward(x, params, scale))
    ref = reference_forward(x, params, scale)

    assert out.shape == (N, cout, H * scale, W * scale), out.shape
    # Tolerance relaxed vs. the f32 reference because the upsample FIR matmuls run
    # in bf16 (taps exact, operands rounded); pointwise stage is exact f32.
    np.testing.assert_allclose(np.asarray(out), np.asarray(ref), rtol=2e-2, atol=5e-2)
    print("KERNEL_OK")
</pallas_src>

<mosaic_0001>
module attributes {stable_mosaic.version = 11 : i64} {
  func.func @_pointwise_kernel(%arg0: i32, %arg1: i32, %arg2: memref<1x8x256xf32, #tpu.memory_space<vmem>>, %arg3: memref<4x8xf32, #tpu.memory_space<vmem>>, %arg4: memref<4x1xf32, #tpu.memory_space<vmem>>, %arg5: memref<4x4xf32, #tpu.memory_space<vmem>>, %arg6: memref<4x1xf32, #tpu.memory_space<vmem>>, %arg7: memref<1x4x256xf32, #tpu.memory_space<vmem>>) attributes {dimension_semantics = [#tpu.dimension_semantics<parallel>, #tpu.dimension_semantics<parallel>], iteration_bounds = array<i64: 2, 1>, scalar_prefetch = 0 : i64, scratch_operands = 0 : i64, tpu.core_type = #tpu.core_type<tc>, window_params = [{transform_indices = @transform_0, window_bounds = array<i64: 1, 8, 256>}, {pipeline_mode = #tpu.pipeline_mode<synchronous>, transform_indices = @transform_1, window_bounds = array<i64: 4, 8>}, {pipeline_mode = #tpu.pipeline_mode<synchronous>, transform_indices = @transform_2, window_bounds = array<i64: 4, 1>}, {pipeline_mode = #tpu.pipeline_mode<synchronous>, transform_indices = @transform_3, window_bounds = array<i64: 4, 4>}, {pipeline_mode = #tpu.pipeline_mode<synchronous>, transform_indices = @transform_4, window_bounds = array<i64: 4, 1>}, {transform_indices = @transform_5, window_bounds = array<i64: 1, 4, 256>}]} {
    %c0 = arith.constant 0 : index
    %c0_0 = arith.constant 0 : index
    %c0_1 = arith.constant 0 : index
    %0 = vector.load %arg2[%c0, %c0_0, %c0_1] : memref<1x8x256xf32, #tpu.memory_space<vmem>>, vector<1x8x256xf32>
    %1 = vector.shape_cast %0 : vector<1x8x256xf32> to vector<8x256xf32>
    %c0_2 = arith.constant 0 : index
    %c0_3 = arith.constant 0 : index
    %2 = vector.load %arg3[%c0_2, %c0_3] : memref<4x8xf32, #tpu.memory_space<vmem>>, vector<4x8xf32>
    %cst = arith.constant dense<0.000000e+00> : vector<4x256xf32>
    %3 = tpu.matmul %2, %1, %cst {dimension_numbers = #tpu.dot_dimension_numbers<[1], [0], [0], [1], [0, 0, 1, 1], [], []>} : vector<4x8xf32>, vector<8x256xf32>, vector<4x256xf32> -> vector<4x256xf32>
    %c0_4 = arith.constant 0 : index
    %c0_5 = arith.constant 0 : index
    %4 = vector.load %arg4[%c0_4, %c0_5] : memref<4x1xf32, #tpu.memory_space<vmem>>, vector<4x1xf32>
    %5 = vector.broadcast %4 : vector<4x1xf32> to vector<4x256xf32>
    %6 = arith.addf %3, %5 : vector<4x256xf32>
    %cst_6 = arith.constant 0.000000e+00 : f32
    %7 = vector.broadcast %cst_6 : f32 to vector<4x256xf32>
    %8 = arith.cmpf oge, %6, %7 : vector<4x256xf32>
    %cst_7 = arith.constant 1.000000e+00 : f32
    %cst_8 = arith.constant 2.000000e-01 : f32
    %9 = vector.broadcast %cst_7 : f32 to vector<4x256xf32>
    %10 = vector.broadcast %cst_8 : f32 to vector<4x256xf32>
    %11 = arith.select %8, %9, %10 : vector<4x256xi1>, vector<4x256xf32>
    %12 = arith.mulf %6, %11 : vector<4x256xf32>
    %c0_9 = arith.constant 0 : index
    %c0_10 = arith.constant 0 : index
    %13 = vector.load %arg5[%c0_9, %c0_10] : memref<4x4xf32, #tpu.memory_space<vmem>>, vector<4x4xf32>
    %cst_11 = arith.constant dense<0.000000e+00> : vector<4x256xf32>
    %14 = tpu.matmul %13, %12, %cst_11 {dimension_numbers = #tpu.dot_dimension_numbers<[1], [0], [0], [1], [0, 0, 1, 1], [], []>} : vector<4x4xf32>, vector<4x256xf32>, vector<4x256xf32> -> vector<4x256xf32>
    %c0_12 = arith.constant 0 : index
    %c0_13 = arith.constant 0 : index
    %15 = vector.load %arg6[%c0_12, %c0_13] : memref<4x1xf32, #tpu.memory_space<vmem>>, vector<4x1xf32>
    %16 = vector.broadcast %15 : vector<4x1xf32> to vector<4x256xf32>
    %17 = arith.addf %14, %16 : vector<4x256xf32>
    %c0_14 = arith.constant 0 : index
    %c0_15 = arith.constant 0 : index
    %c0_16 = arith.constant 0 : index
    %18 = vector.load %arg7[%c0_14, %c0_15, %c0_16] : memref<1x4x256xf32, #tpu.memory_space<vmem>>, vector<1x4x256xf32>
    %19 = vector.shape_cast %18 : vector<1x4x256xf32> to vector<4x256xf32>
    %20 = vector.shape_cast %17 : vector<4x256xf32> to vector<1x4x256xf32>
    tpu.vector_store %arg7[%c0_14, %c0_15, %c0_16], %20 {strides = array<i32>} : memref<1x4x256xf32, #tpu.memory_space<vmem>>, vector<1x4x256xf32>,
    return
  }
  func.func @transform_0(%arg0: i32, %arg1: i32) -> (i32, i32, i32) {
    %c0_i32 = arith.constant 0 : i32
    %c0_i32_0 = arith.constant 0 : i32
    return %arg0, %c0_i32, %arg1 : i32, i32, i32
  }
  func.func @transform_1(%arg0: i32, %arg1: i32) -> (i32, i32) {
    %c0_i32 = arith.constant 0 : i32
    %c0_i32_0 = arith.constant 0 : i32
    %c0_i32_1 = arith.constant 0 : i32
    return %c0_i32, %c0_i32_0 : i32, i32
  }
  func.func @transform_2(%arg0: i32, %arg1: i32) -> (i32, i32) {
    %c0_i32 = arith.constant 0 : i32
    %c0_i32_0 = arith.constant 0 : i32
    %c0_i32_1 = arith.constant 0 : i32
    return %c0_i32, %c0_i32_0 : i32, i32
  }
  func.func @transform_3(%arg0: i32, %arg1: i32) -> (i32, i32) {
    %c0_i32 = arith.constant 0 : i32
    %c0_i32_0 = arith.constant 0 : i32
    %c0_i32_1 = arith.constant 0 : i32
    return %c0_i32, %c0_i32_0 : i32, i32
  }
  func.func @transform_4(%arg0: i32, %arg1: i32) -> (i32, i32) {
    %c0_i32 = arith.constant 0 : i32
    %c0_i32_0 = arith.constant 0 : i32
    %c0_i32_1 = arith.constant 0 : i32
    return %c0_i32, %c0_i32_0 : i32, i32
  }
  func.func @transform_5(%arg0: i32, %arg1: i32) -> (i32, i32, i32) {
    %c0_i32 = arith.constant 0 : i32
    %c0_i32_0 = arith.constant 0 : i32
    return %arg0, %c0_i32, %arg1 : i32, i32, i32
  }
}

</mosaic_0001>

<bundles_post_ra>
// kernel: tpu_custom_call.1
= control target key start
LH: loop header
LB: loop body
LE: loop exit
PB: predicated region body
PF: predicated region fallthrough
CT: control target
= control target key end

     0   :  { %10 = vsyncpa [#allocation3], 0  ;;  %s967_s0 = inlined_call_operand.hbm [shape: f32[2,8,256], index: 0, kind: input, shape index: {}]   ;;  %s968_s1 = inlined_call_operand.vmem [shape: f32[4,8], index: 1, kind: input, shape index: {}]   ;;  %s969_s2 = inlined_call_operand.vmem [shape: f32[4,1], index: 2, kind: input, shape index: {}]   ;;  %s970_s3 = inlined_call_operand.vmem [shape: f32[4,4], index: 3, kind: input, shape index: {}]   ;;  %s971_s4 = inlined_call_operand.vmem [shape: f32[4,1], index: 4, kind: input, shape index: {}]   ;;  %s972_s5 = inlined_call_operand.hbm [shape: f32[2,4,256], index: 5, kind: output, shape index: {}]  }
   0x1   :  { %12 = vsyncpa [#allocation3 + $0x1], 0 }
   0x2   :  { %13 = vsyncpa [#allocation4], 0 }
   0x3   :  { %15 = vsyncpa [#allocation4 + $0x1], 0  ;;  %s782_s18 = smov 0   ;;  %s784_s19 = smov 0  }
   0x4   :  { %s786_s20 = smov 0   ;;  %s788_s21 = smov 0  }
   0x5   :  { %s790_s22 = smov 0   ;;  %s792_s23 = smov 0  }
   0x6 LB: > { %s546_s24 = sadd.s32 4294967295, %s745_s23   ;;  %s547_s25 = sadd.s32 4294967294, %s745_s23   ;;  %s745_s23 = sphi %s792_s23, %s21_s23   ;;  %s741_s22 = sphi %s790_s22, %s988_s22   ;;  %s737_s21 = sphi %s788_s21, %s987_s21   ;;  %s733_s20 = sphi %s786_s20, %s986_s20   ;;  %s729_s19 = sphi %s784_s19, %s985_s19   ;;  %s725_s18 = sphi %s782_s18, %s984_s18  }
   0x7   : > { %s33_s26 = sadd.s32 1, %s741_s22  ;;  %s42_s27 = sadd.s32 1, %s733_s20 }
   0x8   : > { %p35_p0 = scmp.ge.s32.totalorder %s33_s26, 2  ;;  %p49_p1 = scmp.ne.s32.totalorder %s733_s20, %s729_s19 }
   0x9   : > { %p50_p2 = scmp.eq.s32.totalorder %s745_s23, 0  ;;  %p55_p3 = scmp.ne.s32.totalorder %s729_s19, %s725_s18 }
   0xa   : > { %s990_s26 = smov (%p35_p0, %s33_s26), 0  ;;  %p56_p5 = scmp.eq.s32.totalorder %s546_s24, 0 }
   0xb   : > { %p823_p4 = por %p50_p2, %p49_p1  ;;  %s37_s29 = ssub.s32 %s741_s22, %s990_s26 }
   0xc   : > { %p165_p6 = scmp.eq.s32.totalorder %s546_s24, 1  ;;  %p40_p7 = scmp.eq.s32.totalorder %s37_s29, 0 }
   0xd   : > { %p829_p8 = por %p56_p5, %p55_p3  ;;  %p171_p10 = scmp.eq.s32.totalorder %s547_s25, 1 }
   0xe   : > { %p833_p9 = por %p165_p6, %p49_p1  ;;  %p579_p13 = scmp.lt.s32.totalorder %s745_s23, 2 }
   0xf   : > { %s838_s7 = scalar_select %p40_p7, %s733_s20, %s42_s27  }
  0x10   : > { %s976_s6 = scalar_select %p833_p9, 1, 0 }
  0x11   : > { %p840_p11 = por %p171_p10, %p55_p3  ;;  %s203_s9 = sand.u32 1, %s733_s20  }
  0x12   : > { %s550_s10 = sshll.u32 %s203_s9, 4  ;;  %s565_s11 = sshll.u32 %s741_s22, 8 }
  0x13   : > { %s977_s8 = scalar_select %p840_p11, 1, 0 }
  0x14   : > { %s851_s14 = scalar_lea.hbm %s967_s0, %s565_s11  ;;  %s207_s15 = scalar_lea.vmem [#allocation2], %s550_s10 }
  0x15   : > { %s217_s16 = sshll.u32 %s207_s15, 4  ;;  %p857_p0 = pnand %p579_p13, %p823_p4  ;;  %s853_s16 = int_to_ptr.vmem [resolvable:$true] %s217_s16 }
  0x16   : > { %s204_s24 = scalar_lea.sflag [#allocation3], %s203_s9  ;;  %s633_s25 = scalar_lea.hbm %s851_s14, 256 }
  0x17   : > { %p634_p3 = scmp.ne.s32.totalorder %s851_s14, %s633_s25  ;;  %p635_p5 = pneg %p857_p0 }
  0x18   : > { %s638_s28 = scalar_lea.hbm %s967_s0, 512  ;;  %p639_p4 = scmp.lt.u32.totalorder %s851_s14, %s967_s0 }
  0x19   : > { %p636_p6 = pnand %p635_p5, %p634_p3  ;;  %p640_p10 = scmp.lt.u32.totalorder %s638_s28, %s633_s25 }
  0x1a   : > { %p642_p12 = scmp.lt.u32.totalorder %s633_s25, %s851_s14 }
  0x1b   : > { %p637_p7 = pneg %p636_p6  ;;  %p641_p13 = por %p640_p10, %p639_p4 }
  0x1d   : > { %p643_p1 = por %p642_p12, %p641_p13 }
  0x1f   : > { %p644_p2 = pnand %p643_p1, %p637_p7 }
  0x21   : > { %647 = shalt.err (!%p644_p2)
}
  0x22   : > { %s648_s9 = scalar_lea.vmem %s853_s16, 256  ;;  %s747_s12 = smov [#allocation2]  }
  0x23   : > { %p649_p3 = scmp.ne.s32.totalorder %s853_s16, %s648_s9  ;;  %s653_s13 = sshll.u32 %s747_s12, 4  ;;  %s654_s13 = int_to_ptr.vmem [resolvable:$false] %s653_s13 }
  0x24   : > { %s655_s15 = scalar_lea.vmem %s654_s13, 512  ;;  %p656_p9 = scmp.lt.s32.totalorder %s853_s16, %s654_s13 }
  0x25   : > { %p651_p6 = pnand %p649_p3, %p635_p5  ;;  %p657_p4 = scmp.lt.s32.totalorder %s655_s15, %s648_s9 }
  0x27   : > { %p652_p11 = pneg %p651_p6  ;;  %p658_p10 = por %p657_p4, %p656_p9 }
  0x29   : > { %p659_p12 = pnand %p658_p10, %p652_p11 }
  0x2b   : > { %662 = shalt.err (!%p659_p12)
}
  0x2c   : > { %574 = dma.hbm_to_vmem [thread:$0]  (!%p857_p0), %s851_s14, 256, %s853_s16, %s204_s24  }
  0x2d   : > { %p979_p1 = scmp.lt.s32.totalorder %s745_s23, 3  ;;  %p980_p2 = scmp.ge.s32.totalorder %s745_s23, 1 }
  0x2f   : > { %p223_p5 = pnand %p980_p2, %p979_p1 }
  0x30   : > { %s893_s25 = sand.u32 (!%p223_p5), 1, %s729_s19  }
  0x31   : > { %226 = sbr.rel (%p223_p5) target bundleno = 513 (0x201), region = 40  ;;  %s554_s27 = sshll.u32 (!%p223_p5), %s893_s25, 4 }
  0x32   : > { %s229_s29 = scalar_lea.sflag (!%p223_p5), [#allocation3], %s893_s25  ;;  %s232_s28 = scalar_lea.vmem (!%p223_p5), [#allocation2], %s554_s27 }
  0x38   : > { %716 = dma.done.wait (%p829_p8), %s229_s29, 256  }
  0x39   : > { %718 = vsyncadd (%p829_p8), %s229_s29, 4294967040  ;;  %v748_v0 = vmov 0.0   ;;  %v749_v1 = vmov 0   ;;  %v262_v2 = vld [vmem:[%s232_s28 + $0x8] sm:$0xff]  ;;  %v261_v3 = vld [vmem:[%s232_s28] sm:$0xff]  ;;  %vm270_vm0 = vcmask 64512  }
  0x3a   : > { %338 = vmatprep.mubr.f32.mxu0 %v748_v0  ;;  %632 = vset.pattern.permute.xlu0 %v749_v1  ;;  %v263_v4 = vld [vmem:[%s968_s1] sm:$0xf]  ;;  %v750_v12 = vmov 0.2   ;;  %vm362_vm3 = vcmask 1043456   ;;  %vm358_vm4 = vcmask 31744  }
  0x3b   : > { %433 = vmatprep.mubr.f32.mxu1 %v748_v0  ;;  %274 = vmatprep.subr.mxu0 %v262_v2  ;;  %v264_v5 = vld [vmem:[%s969_s2] sm:$0xf]  ;;  %s555_s12 = sshll.u32 %s893_s25, 3  ;;  %s566_s13 = sshll.u32 %s737_s21, 7 }
  0x3c   : > { %275 = vmatpush1.msra.mxu0 %v261_v3  ;;  %267 = vperm.xlu0 %632, %v264_v5   ;;  %v352_v6 = vld [vmem:[%s971_s4] sm:$0xf]  ;;  %s258_s15 = scalar_lea.vmem [#allocation5], %s555_s12  ;;  %s918_s14 = scalar_lea.hbm %s972_s5, %s566_s13 }
  0x3d   : > { %556 = vmatmul.mubr.msk.f32.vlgmr.msra.gmra.mrb[0].mxu0 %vm270_vm0, %v263_v4  ;;  %v351_v17 = vld [vmem:[%s970_s3] sm:$0xf]  ;;  %s462_s27 = sshll.u32 %s258_s15, 4  ;;  %s446_s16 = scalar_lea.sflag [#allocation4], %s893_s25  ;;  %s920_s27 = int_to_ptr.vmem [resolvable:$true] %s462_s27 }
  0x3e   : > { %s663_s17 = scalar_lea.vmem %s920_s27, 128  ;;  %p981_p9 = scmp.ne.s32.totalorder %s976_s6, 0 }
  0x3f   : > { %p664_p8 = scmp.ne.s32.totalorder %s920_s27, %s663_s17  ;;  %s751_s21 = smov [#allocation5]  }
  0x40   : > { %355 = vperm.xlu0 %632, %v352_v6   ;;  %s667_s24 = sshll.u32 %s751_s21, 4  ;;  %s668_s24 = int_to_ptr.vmem [resolvable:$false] %s667_s24 }
  0x41   : > { %p665_p11 = pnand %p664_p8, %p981_p9  ;;  %s669_s30 = scalar_lea.vmem %s668_s24, 256 }
  0x42   : > { %p670_p7 = scmp.lt.s32.totalorder %s920_s27, %s668_s24  ;;  %p671_p13 = scmp.lt.s32.totalorder %s669_s30, %s663_s17 }
  0x43   : > { %p666_p0 = pneg %p665_p11 }
  0x44   : > { %p672_p3 = por %p671_p13, %p670_p7 }
  0x46   : > { %p673_p6 = pnand %p672_p3, %p666_p0 }
  0xbb   : > { %v268_v7 = vpop.permute.xlu0 %267 }
  0xbf   : > { %v356_v18 = vpop.permute.xlu0 %355 }
 0x110   : > { %v340_v8 = vpop.f32.mrb[0].mxu0 }
 0x111   : > { %v341_v9 = vadd.f32 %v340_v8, %v268_v7  ;;  %v342_v10 = vpop.f32.mrb[1].mxu0 }
 0x112   : > { %v343_v11 = vadd.f32 %v342_v10, %v268_v7 }
 0x113   : > { %vm345_vm1 = vcmp.ge.f32.partialorder %v341_v9, 0.0 }
 0x114   : > { %v347_v13 = vsel %vm345_vm1, 1.0, %v750_v12  ;;  %vm346_vm2 = vcmp.ge.f32.partialorder %v343_v11, 0.0 }
 0x115   : > { %v348_v14 = vsel %vm346_vm2, 1.0, %v750_v12  ;;  %v349_v16 = vmul.f32 %v347_v13, %v341_v9 }
 0x116   : > { %v350_v15 = vmul.f32 %v348_v14, %v343_v11 }
 0x118   : > { %557 = vmatprep.subr.msk.mxu1 %vm362_vm3, %v350_v15 }
 0x119   : > { %558 = vmatpush1.msk.msra.mxu1 %vm362_vm3, %v349_v16 }
 0x11a   : > { %559 = vmatmul.mubr.msk.f32.vlgmr.msra.gmra.mrb[0].mxu1 %vm358_vm4, %v351_v17 }
 0x1ed   : > { %v435_v19 = vpop.f32.mrb[0].mxu1 }
 0x1ee   : > { %v436_v20 = vadd.f32 %v435_v19, %v356_v18  ;;  %v437_v21 = vpop.f32.mrb[1].mxu1 }
 0x1ef   : > { %v438_v22 = vadd.f32 %v437_v21, %v356_v18 }
 0x1f1   : > { %v442_v23 = vcombine.low %v436_v20, %v438_v22 }
 0x1f3   : > { %444 = vst [vmem:[%s258_s15] sm:$0xff] %v442_v23 }
 0x1f4   : > { %676 = shalt.err (!%p673_p6)
}
 0x1f5   : > { %s677_s25 = scalar_lea.hbm %s918_s14, 128  ;;  %s681_s9 = scalar_lea.hbm %s972_s5, 256 }
 0x1f6   : > { %p678_p4 = scmp.ne.s32.totalorder %s918_s14, %s677_s25  ;;  %p682_p1 = scmp.lt.u32.totalorder %s918_s14, %s972_s5 }
 0x1f7   : > { %p683_p2 = scmp.lt.u32.totalorder %s681_s9, %s677_s25  ;;  %p685_p8 = scmp.lt.u32.totalorder %s677_s25, %s918_s14 }
 0x1f8   : > { %p679_p10 = pnand %p678_p4, %p981_p9 }
 0x1f9   : > { %p684_p5 = por %p683_p2, %p682_p1 }
 0x1fa   : > { %p680_p12 = pneg %p679_p10 }
 0x1fb   : > { %p686_p11 = por %p685_p8, %p684_p5 }
 0x1fd   : > { %p687_p0 = pnand %p686_p11, %p680_p12 }
 0x1ff   : > { %690 = shalt.err (!%p687_p0)
}
 0x200   : > { %569 = dma.vmem_to_hbm [thread:$0]  (%p981_p9), %s920_s27, 128, %s918_s14, %s446_s16  }
 0x201 PF: > { %s474_s15 = sand.u32 1, %s725_s18   ;;  %p982_p7 = scmp.ne.s32.totalorder %s977_s8, 0 }
 0x202   : > { %p983_p13 = scmp.ge.s32.totalorder %s745_s23, 2  ;;  %s475_s29 = scalar_lea.sflag [#allocation4], %s474_s15 }
 0x204   : > { %p576_p3 = pnand %p983_p13, %p982_p7 }
 0x206   : > { %720 = dma.done.wait (!%p576_p3), %s475_s29, 128  }
 0x207   : > { %722 = vsyncadd (!%p576_p3), %s475_s29, 4294967168  ;;  %s21_s23 = sadd.s32 1, %s745_s23   ;;  %s984_s18 = smov %s729_s19 }
 0x208   : > { %p18_p6 = scmp.ge.s32.totalorder %s21_s23, 4   ;;  %s985_s19 = smov %s733_s20 }
 0x209   : > { %s986_s20 = smov %s838_s7  ;;  %s987_s21 = smov %s741_s22 }
 0x20a   : > { %s988_s22 = smov %s990_s26  ;;  %20 = sbr.rel (!%p18_p6) target bundleno = 6 (0x6), region = 85 }
 0x211   :  { %480 = vsyncpa [#allocation3], 1 }
 0x212   :  { %482 = vsyncpa [#allocation3 + $0x1], 1 }
 0x213   :  { %483 = vsyncpa [#allocation4], 1 }
 0x214   :  { %485 = vsyncpa [#allocation4 + $0x1], 1 }

</bundles_post_ra>
